<compile_context>
chip_gen: v7x
topology: tpu7x:2x2x1
jax: 0.10.0
libtpu: 0.0.40
codegen_flags: <defaults>
</compile_context>

<pallas_src>
import functools

import numpy as np
import jax
import jax.numpy as jnp
from jax.experimental import pallas as pl
from jax.experimental.pallas import tpu as pltpu


# ---------------------------------------------------------------------------
# Pallas kernel: one (TM, Dn) row-tile of  z @ WT   (WT pre-transposed)
# ---------------------------------------------------------------------------
def _linear_flow_matmul_kernel(z_ref, wt_ref, out_ref, *, operand_dtype):
    # In-kernel cast rides idle VALU slots and keeps z's HBM traffic at a
    # single read of the original dtype (no wrapper-side convert pass).
    z = z_ref[...].astype(operand_dtype)
    out_ref[...] = jax.lax.dot_general(
        z, wt_ref[...],
        dimension_numbers=(((1,), (0,)), ((), ())),   # standard K-major contraction
        preferred_element_type=jnp.float32,           # f32 MXU accumulation
    ).astype(out_ref.dtype)


def _pick_tm(rows, requested, align):
    """Largest `align`-aligned divisor of `rows` that is <= requested.

    Guarantees the grid exactly tiles the batch (no jnp.pad of z, no out[:B]
    slice -> no extra HBM passes).  Falls back to a single full-extent block
    (always legal) for tiny / awkward row counts.
    """
    cap = min(requested, rows)
    if rows % align == 0 and cap >= align:
        t = (cap // align) * align
        while t >= align:
            if rows % t == 0:
                return t
            t -= align
    # TODO(synk): for huge batches with no aligned divisor (e.g. prime rows),
    # add a ragged last-block path instead of one full-extent block.
    return rows


def _build_weight(P, LF_L, LF_U, LF_S, sign_s):
    """Batch-independent W = P @ (L*mask_L + I) @ (U*mask_U + diag(sign*exp(S)))."""
    D = P.shape[0]
    idx = jnp.arange(D)
    mask_L = (idx[:, None] > idx[None, :]).astype(jnp.float32)   # strictly lower
    mask_U = (idx[:, None] < idx[None, :]).astype(jnp.float32)   # strictly upper
    L_ = LF_L * mask_L + jnp.eye(D, dtype=jnp.float32)
    U_ = LF_U * mask_U + jnp.diag(sign_s * jnp.exp(LF_S))
    return P @ L_ @ U_


# ---------------------------------------------------------------------------
# Wrapper
# ---------------------------------------------------------------------------
@functools.partial(jax.jit, static_argnames=("tm", "operand_dtype", "out_dtype"))
def linear_flow_forward(z, ldj, P, LF_L, LF_U, LF_S, sign_s, *,
                        tm=512, operand_dtype=jnp.float32, out_dtype=None):
    """Forward of Linear_flow: returns (z @ W.T, ldj + sum(LF_S))."""
    B, D = z.shape
    operand_dtype = jnp.dtype(operand_dtype)
    out_dtype = jnp.dtype(out_dtype) if out_dtype is not None else operand_dtype

    # --- batch-independent weight (f32, plain XLA), pre-transposed ----------
    W = _build_weight(P, LF_L, LF_U, LF_S, sign_s)
    WT = W.T                                                     # (D, D)

    # --- log-det update stays in XLA (scalar broadcast, no width-1 stores) --
    ldj_out = ldj + jnp.sum(LF_S)

    # --- lane-dense repack for small D (e.g. D=32 -> 128-wide stores) -------
    r = 1
    if D < 128 and 128 % D == 0 and B % (128 // D) == 0:
        r = 128 // D
    if r > 1:
        # out4 = z4 @ kron(I_r, W.T): block-diagonal weight, free reshapes.
        z_in = z.reshape(B // r, r * D)
        WT_full = jnp.kron(jnp.eye(r, dtype=WT.dtype), WT)       # (128, 128)
    else:
        z_in = z
        WT_full = WT
    rows, Dk = z_in.shape
    Dn = WT_full.shape[1]
    WT_op = WT_full.astype(operand_dtype)                        # tiny, wrapper cast is fine

    # --- batch tiling: aligned divisor of rows -> no pad / slice ------------
    align = 16 if min(operand_dtype.itemsize, out_dtype.itemsize) <= 2 else 8
    tm_eff = _pick_tm(rows, tm, align)
    n_blocks = rows // tm_eff

    # --- weight buffering + VMEM budget --------------------------------------
    w_bytes = Dk * Dn * operand_dtype.itemsize
    single_buffer_w = w_bytes > (4 << 20)       # constant-index block: never re-fetched
    w_spec_kwargs = dict(pipeline_mode=pl.Buffered(1)) if single_buffer_w else {}

    w_bufs = 1 if single_buffer_w else 2
    est = (2 * tm_eff * Dk * z_in.dtype.itemsize          # double-buffered z tiles (f32)
           + w_bufs * w_bytes                              # weight
           + 2 * tm_eff * Dn * out_dtype.itemsize)         # double-buffered out tiles
    vmem_limit = None
    if est > (12 << 20):                                   # exceeds v5e's 16 MiB default scoped limit
        try:
            vmem_cap = pltpu.get_tpu_info().vmem_capacity_bytes
        except Exception:
            vmem_cap = 64 << 20                            # v7x physical per-TC
        vmem_limit = int(min(est + (8 << 20), int(vmem_cap * 0.9)))
    # TODO(synk): for very large D (D*D*bytes*w_bufs approaching VMEM), add K/N
    # tiling of W with an accumulator scratch and an "arbitrary" reduction axis.

    def kernel(z_ref, wt_ref, out_ref):
        _linear_flow_matmul_kernel(z_ref, wt_ref, out_ref, operand_dtype=operand_dtype)

    out = pl.pallas_call(
        kernel,
        out_shape=jax.ShapeDtypeStruct((rows, Dn), out_dtype),
        grid_spec=pltpu.PrefetchScalarGridSpec(
            num_scalar_prefetch=0,
            grid=(n_blocks,),
            in_specs=[
                pl.BlockSpec((tm_eff, Dk), lambda i: (i, 0)),                  # z row tile
                pl.BlockSpec((Dk, Dn), lambda i: (0, 0), **w_spec_kwargs),     # weight (constant)
            ],
            out_specs=pl.BlockSpec((tm_eff, Dn), lambda i: (i, 0)),
        ),
        compiler_params=pltpu.CompilerParams(
            dimension_semantics=("parallel",),            # megacore / 2-TC batch sharding
            vmem_limit_bytes=vmem_limit,
        ),
    )(z_in, WT_op)

    if r > 1:
        out = out.reshape(B, D)                            # free (row-major contiguous)
    return out, ldj_out


# ---------------------------------------------------------------------------
# Deterministic parameter construction (mirrors Linear_flow.__init__)
# ---------------------------------------------------------------------------
def make_params(z_dim, key):
    A = jax.random.normal(key, (z_dim, z_dim), dtype=jnp.float32)
    Q, R = jnp.linalg.qr(A)
    Q = Q * jnp.sign(jnp.diag(R))[None, :]                 # orthogonal init

    P, L, U_full = jax.scipy.linalg.lu(Q)                  # W_init = P @ L @ U
    s = jnp.diag(U_full)
    sign_s = jnp.sign(s)
    log_s = jnp.log(jnp.abs(s))
    U = jnp.triu(U_full, k=1)

    return dict(P=P.astype(jnp.float32),
                LF_L=L.astype(jnp.float32),
                LF_U=U.astype(jnp.float32),
                LF_S=log_s.astype(jnp.float32),
                sign_s=sign_s.astype(jnp.float32))


def reference_forward(z, ldj, p):
    W = _build_weight(p["P"], p["LF_L"], p["LF_U"], p["LF_S"], p["sign_s"])
    z_out = jnp.matmul(z, W.T, precision=jax.lax.Precision.HIGHEST)
    return z_out, ldj + jnp.sum(p["LF_S"])


if __name__ == "__main__":
    key = jax.random.PRNGKey(0)
    k_param, k_z, k_ldj, k_param2, k_z2, k_ldj2 = jax.random.split(key, 6)

    # --- module-realistic size: batch=64, z_dim=32 (lane-dense packed path) ---
    z_dim, batch = 32, 64
    params = make_params(z_dim, k_param)
    z = jax.random.normal(k_z, (batch, z_dim), dtype=jnp.float32)
    ldj = jax.random.normal(k_ldj, (batch,), dtype=jnp.float32)

    z_ref, ldj_ref = reference_forward(z, ldj, params)
    z_ref = np.asarray(z_ref)
    ldj_ref = np.asarray(ldj_ref)

    # f32 operands / f32 output. Tolerances are moderate because the reference
    # GEMM (XLA) and the kernel GEMM (Mosaic) may use different f32 MXU pass
    # counts; structural errors would be O(1), so correctness is still checked.
    z_f32, ldj_f32 = linear_flow_forward(
        z, ldj, params["P"], params["LF_L"], params["LF_U"], params["LF_S"],
        params["sign_s"])
    jax.block_until_ready((z_f32, ldj_f32))
    assert np.allclose(np.asarray(z_f32), z_ref, atol=1e-2, rtol=1e-2)
    assert np.allclose(np.asarray(ldj_f32), ldj_ref, atol=1e-4, rtol=1e-4)

    # bf16 operands / bf16 output / f32 MXU accumulation (fast path on all gens).
    z_bf16, ldj_bf16 = linear_flow_forward(
        z, ldj, params["P"], params["LF_L"], params["LF_U"], params["LF_S"],
        params["sign_s"], operand_dtype=jnp.bfloat16)
    jax.block_until_ready((z_bf16, ldj_bf16))
    assert np.allclose(np.asarray(z_bf16).astype(np.float32), z_ref,
                       atol=6e-2, rtol=6e-2)
    assert np.allclose(np.asarray(ldj_bf16), ldj_ref, atol=1e-4, rtol=1e-4)

    # --- D=128 plain path with a multi-step "parallel" batch grid -------------
    z_dim2, batch2 = 128, 256
    params2 = make_params(z_dim2, k_param2)
    z2 = jax.random.normal(k_z2, (batch2, z_dim2), dtype=jnp.float32)
    ldj2 = jax.random.normal(k_ldj2, (batch2,), dtype=jnp.float32)
    z2_ref, ldj2_ref = reference_forward(z2, ldj2, params2)
    z2_out, ldj2_out = linear_flow_forward(
        z2, ldj2, params2["P"], params2["LF_L"], params2["LF_U"], params2["LF_S"],
        params2["sign_s"], tm=64)
    jax.block_until_ready((z2_out, ldj2_out))
    assert np.allclose(np.asarray(z2_out), np.asarray(z2_ref), atol=1e-2, rtol=1e-2)
    assert np.allclose(np.asarray(ldj2_out), np.asarray(ldj2_ref), atol=1e-4, rtol=1e-4)

    print("KERNEL_OK")
</pallas_src>

<mosaic_0001>
module attributes {stable_mosaic.version = 11 : i64} {
  func.func @kernel(%arg0: i32, %arg1: memref<16x128xf32, #tpu.memory_space<vmem>>, %arg2: memref<128x128xf32, #tpu.memory_space<vmem>>, %arg3: memref<16x128xf32, #tpu.memory_space<vmem>>) attributes {dimension_semantics = [#tpu.dimension_semantics<parallel>], iteration_bounds = array<i64: 1>, scalar_prefetch = 0 : i64, scratch_operands = 0 : i64, tpu.core_type = #tpu.core_type<tc>, window_params = [{transform_indices = @transform_0, window_bounds = array<i64: 16, 128>}, {pipeline_mode = #tpu.pipeline_mode<synchronous>, transform_indices = @transform_1, window_bounds = array<i64: 128, 128>}, {transform_indices = @transform_2, window_bounds = array<i64: 16, 128>}]} {
    %c0 = arith.constant 0 : index
    %c0_0 = arith.constant 0 : index
    %0 = vector.load %arg1[%c0, %c0_0] : memref<16x128xf32, #tpu.memory_space<vmem>>, vector<16x128xf32>
    %c0_1 = arith.constant 0 : index
    %c0_2 = arith.constant 0 : index
    %1 = vector.load %arg2[%c0_1, %c0_2] : memref<128x128xf32, #tpu.memory_space<vmem>>, vector<128x128xf32>
    %cst = arith.constant dense<0.000000e+00> : vector<16x128xf32>
    %2 = tpu.matmul %0, %1, %cst {dimension_numbers = #tpu.dot_dimension_numbers<[1], [0], [0], [1], [0, 0, 1, 1], [], []>} : vector<16x128xf32>, vector<128x128xf32>, vector<16x128xf32> -> vector<16x128xf32>
    %c0_3 = arith.constant 0 : index
    %c0_4 = arith.constant 0 : index
    %3 = vector.load %arg3[%c0_3, %c0_4] : memref<16x128xf32, #tpu.memory_space<vmem>>, vector<16x128xf32>
    tpu.vector_store %arg3[%c0_3, %c0_4], %2 {strides = array<i32>} : memref<16x128xf32, #tpu.memory_space<vmem>>, vector<16x128xf32>,
    return
  }
  func.func @transform_0(%arg0: i32) -> (i32, i32) {
    %c0_i32 = arith.constant 0 : i32
    %c0_i32_0 = arith.constant 0 : i32
    return %arg0, %c0_i32 : i32, i32
  }
  func.func @transform_1(%arg0: i32) -> (i32, i32) {
    %c0_i32 = arith.constant 0 : i32
    %c0_i32_0 = arith.constant 0 : i32
    %c0_i32_1 = arith.constant 0 : i32
    return %c0_i32, %c0_i32_0 : i32, i32
  }
  func.func @transform_2(%arg0: i32) -> (i32, i32) {
    %c0_i32 = arith.constant 0 : i32
    %c0_i32_0 = arith.constant 0 : i32
    return %arg0, %c0_i32 : i32, i32
  }
}

</mosaic_0001>

<bundles_post_ra>
// kernel: linear_flow_forward.1
= control target key start
LH: loop header
LB: loop body
LE: loop exit
PB: predicated region body
PF: predicated region fallthrough
CT: control target
= control target key end

     0   :  { %s270_s1 = inlined_call_operand.vmem [shape: f32[128,128], index: 1, kind: input, shape index: {}]   ;;  %s271_s0 = inlined_call_operand.vmem [shape: f32[16,128], index: 0, kind: input, shape index: {}]   ;;  %s272_s2 = inlined_call_operand.vmem [shape: f32[16,128], index: 2, kind: output, shape index: {}]  }
   0x1   :  { %v13_v0 = vld [vmem:[%s270_s1] sm:$0xff]  ;;  %v14_v1 = vld [vmem:[%s270_s1 + $0x8] sm:$0xff]  ;;  %v15_v2 = vld [vmem:[%s270_s1 + $0x10] sm:$0xff] }
   0x2   :  { %v163_v3 = vpack.c.bf16 %v14_v1, %v13_v0  ;;  %v16_v4 = vld [vmem:[%s270_s1 + $0x18] sm:$0xff]  ;;  %v17_v6 = vld [vmem:[%s270_s1 + $0x20] sm:$0xff]  ;;  %v18_v7 = vld [vmem:[%s270_s1 + $0x28] sm:$0xff] }
   0x3   :  { %v167_v5 = vpack.c.bf16 %v16_v4, %v15_v2  ;;  %v171_v8 = vpack.c.bf16 %v18_v7, %v17_v6  ;;  %v11_v9 = vld [vmem:[%s271_s0] sm:$0xff]  ;;  %v19_v10 = vld [vmem:[%s270_s1 + $0x30] sm:$0xff]  ;;  %v20_v11 = vld [vmem:[%s270_s1 + $0x38] sm:$0xff] }
   0x4   :  { %164 = vmatprep.subr.bf16.mxu0 %v163_v3  ;;  %160 = vmatprep.mubr.f32.mxu0 %v11_v9  ;;  %v175_v12 = vpack.c.bf16 %v20_v11, %v19_v10  ;;  %v21_v13 = vld [vmem:[%s270_s1 + $0x40] sm:$0xff]  ;;  %v22_v14 = vld [vmem:[%s270_s1 + $0x48] sm:$0xff]  ;;  %v23_v16 = vld [vmem:[%s270_s1 + $0x50] sm:$0xff] }
   0x5   :  { %166 = vmatpush3.bf16.msra.mxu0 %v163_v3  ;;  %v179_v15 = vpack.c.bf16 %v22_v14, %v21_v13  ;;  %v24_v17 = vld [vmem:[%s270_s1 + $0x58] sm:$0xff]  ;;  %v25_v19 = vld [vmem:[%s270_s1 + $0x60] sm:$0xff]  ;;  %v26_v20 = vld [vmem:[%s270_s1 + $0x68] sm:$0xff] }
   0x6   :  { %168 = vmatprep.subr.bf16.mxu0 %v167_v5  ;;  %v183_v18 = vpack.c.bf16 %v24_v17, %v23_v16  ;;  %v187_v21 = vpack.c.bf16 %v26_v20, %v25_v19  ;;  %v27_v22 = vld [vmem:[%s270_s1 + $0x70] sm:$0xff]  ;;  %v28_v23 = vld [vmem:[%s270_s1 + $0x78] sm:$0xff]  ;;  %v12_v25 = vld [vmem:[%s271_s0 + $0x8] sm:$0xff] }
   0x7   :  { %v191_v24 = vpack.c.bf16 %v28_v23, %v27_v22 }
   0x9   :  { %170 = vmatpush3.bf16.msra.mxu0 %v167_v5 }
   0xa   :  { %172 = vmatprep.subr.bf16.mxu0 %v171_v8 }
   0xd   :  { %174 = vmatpush3.bf16.msra.mxu0 %v171_v8 }
   0xe   :  { %176 = vmatprep.subr.bf16.mxu0 %v175_v12 }
  0x11   :  { %178 = vmatpush3.bf16.msra.mxu0 %v175_v12 }
  0x12   :  { %180 = vmatprep.subr.bf16.mxu0 %v179_v15 }
  0x15   :  { %182 = vmatpush3.bf16.msra.mxu0 %v179_v15 }
  0x16   :  { %184 = vmatprep.subr.bf16.mxu0 %v183_v18 }
  0x19   :  { %186 = vmatpush3.bf16.msra.mxu0 %v183_v18 }
  0x1a   :  { %188 = vmatprep.subr.bf16.mxu0 %v187_v21 }
  0x1d   :  { %190 = vmatpush3.bf16.msra.mxu0 %v187_v21 }
  0x1e   :  { %192 = vmatprep.subr.bf16.mxu0 %v191_v24 }
  0x21   :  { %194 = vmatpush3.bf16.msra.mxu0 %v191_v24 }
  0x24   :  { %161 = vmatmul.mubr.f32.vlgmr.msra.gmra.mrb[0].mxu0 %v12_v25 }
  0xf7   :  { %v162_v26 = vpop.f32.mrb[0].mxu0 }
  0xf8   :  { %105 = vst [vmem:[%s272_s2 + $0x8] sm:$0xff] %v162_v26  ;;  %v95_v27 = vpop.f32.mrb[1].mxu0 }
  0xf9   :  { %104 = vst [vmem:[%s272_s2] sm:$0xff] %v95_v27 }

</bundles_post_ra>
